<compile_context>
chip_gen: v7x
topology: tpu7x:2x2x1
jax: 0.10.0
libtpu: 0.0.40
codegen_flags: <defaults>
</compile_context>

<pallas_src>
import jax
import jax.numpy as jnp
from jax.experimental import pallas as pl
from jax.experimental.pallas import tpu as pltpu

IN_FEATURES = 360
H1 = 256
H2 = 64


def mlp_kernel(x_ref, w1_ref, b1_ref, w2_ref, b2_ref, w3_ref, b3_ref, o_ref):
    # In-kernel cast to bf16 (free under the MXU/DMA); no wrapper pad/cast pass.
    x = x_ref[...].astype(jnp.bfloat16)

    # Layer 1: (TB, 360) bf16 @ (360, 256) bf16 -> f32 accumulate, bias, ReLU.
    h1 = jnp.dot(x, w1_ref[...], preferred_element_type=jnp.float32)
    h1 = jnp.maximum(h1 + b1_ref[...], 0.0)
    # Dropout(0.3): identity at inference.

    # Layer 2: (TB, 256) bf16 @ (256, 64) bf16 -> f32 accumulate, bias, ReLU.
    h2 = jnp.dot(h1.astype(jnp.bfloat16), w2_ref[...],
                 preferred_element_type=jnp.float32)
    h2 = jnp.maximum(h2 + b2_ref[...], 0.0)
    # Dropout(0.2): identity at inference.

    # Layer 3 (N=1): VPU multiply + XLU lane reduction instead of a 1-col MXU pass.
    out = jnp.sum(h2 * w3_ref[...], axis=-1, keepdims=True) + b3_ref[0, 0]
    o_ref[...] = out.astype(o_ref.dtype)


def pack_params(params):
    """One-time packing of model params (do NOT call per forward)."""
    w1, b1, w2, b2, w3, b3 = params
    return (
        w1.astype(jnp.bfloat16),                      # (360, 256)
        b1.astype(jnp.float32).reshape(1, H1),        # (1, 256)
        w2.astype(jnp.bfloat16),                      # (256, 64)
        b2.astype(jnp.float32).reshape(1, H2),        # (1, 64)
        w3.astype(jnp.float32).reshape(1, H2),        # (64, 1) -> (1, 64)
        b3.astype(jnp.float32).reshape(1, 1),         # SMEM scalar
    )


def epigenetic_clock_forward(x, packed, *, max_tile_b=2048):
    """x: (B, 360) float; packed = pack_params(params). Returns (B, 1) f32."""
    w1_b, b1_f, w2_b, b2_f, w3_row, b3_s = packed
    B = x.shape[0]

    # Batch tile: multiple of 16, capped at max_tile_b, and sized so the grid has
    # >= 2 steps whenever B > 16 (keeps both v7x TensorCores busy).
    half = (B + 1) // 2
    tile_b = min(max_tile_b, ((half + 15) // 16) * 16)
    tile_b = max(tile_b, 16)
    b_pad = ((B + tile_b - 1) // tile_b) * tile_b

    x_p = x.astype(jnp.float32)
    if b_pad != B:
        x_p = jnp.pad(x_p, ((0, b_pad - B), (0, 0)))   # batch pad only; no feature pad

    grid = (b_pad // tile_b,)
    const = lambda shape: pl.BlockSpec(shape, lambda i: (0, 0))  # VMEM-resident

    out = pl.pallas_call(
        mlp_kernel,
        out_shape=jax.ShapeDtypeStruct((b_pad, 1), jnp.float32),
        grid=grid,
        in_specs=[
            pl.BlockSpec((tile_b, IN_FEATURES), lambda i: (i, 0)),  # x tile (f32), streamed
            const((IN_FEATURES, H1)),                               # W1 (bf16)
            const((1, H1)),                                         # b1 (f32)
            const((H1, H2)),                                        # W2 (bf16)
            const((1, H2)),                                         # b2 (f32)
            const((1, H2)),                                         # w3 row (f32)
            pl.BlockSpec(memory_space=pltpu.MemorySpace.SMEM),      # b3 scalar
        ],
        out_specs=pl.BlockSpec((tile_b, 1), lambda i: (i, 0)),
        compiler_params=pltpu.CompilerParams(
            dimension_semantics=("parallel",)),
    )(x_p, w1_b, b1_f, w2_b, b2_f, w3_row, b3_s)

    return out[:B]


def init_params(key):
    """Deterministic init mimicking torch.nn.Linear default (uniform +-1/sqrt(fan_in))."""
    dims = [(IN_FEATURES, H1), (H1, H2), (H2, 1)]
    params = []
    for (fan_in, fan_out) in dims:
        key, kw, kb = jax.random.split(key, 3)
        bound = 1.0 / jnp.sqrt(jnp.float32(fan_in))
        w = jax.random.uniform(kw, (fan_in, fan_out), jnp.float32, -bound, bound)
        b = jax.random.uniform(kb, (1, fan_out), jnp.float32, -bound, bound)
        params.extend([w, b])
    return tuple(params)


def reference_forward(x, params):
    w1, b1, w2, b2, w3, b3 = params
    h1 = jnp.maximum(x @ w1 + b1, 0.0)
    h2 = jnp.maximum(h1 @ w2 + b2, 0.0)
    return h2 @ w3 + b3


if __name__ == "__main__":
    key = jax.random.PRNGKey(0)
    key, kx1, kx2 = jax.random.split(key, 3)
    params = init_params(key)
    packed = pack_params(params)   # one-time param packing (bf16 weights, reshaped biases)

    fwd = jax.jit(epigenetic_clock_forward)

    # Small batch (single grid step, tile_b=16 with batch padding 8 -> 16).
    B = 8
    x = jax.random.normal(kx1, (B, IN_FEATURES), dtype=jnp.float32)
    out = jax.block_until_ready(fwd(x, packed))
    ref = reference_forward(x, params)
    assert out.shape == (B, 1), out.shape
    assert jnp.allclose(out, ref, atol=3e-2, rtol=3e-2), "mismatch vs reference (B=8)"

    # Larger batch: exercises the 2-step grid (tile_b=272, pad 520 -> 544).
    B2 = 520
    x2 = jax.random.normal(kx2, (B2, IN_FEATURES), dtype=jnp.float32)
    out2 = jax.block_until_ready(fwd(x2, packed))
    ref2 = reference_forward(x2, params)
    assert out2.shape == (B2, 1), out2.shape
    assert jnp.allclose(out2, ref2, atol=3e-2, rtol=3e-2), "mismatch vs reference (B=520)"

    print("KERNEL_OK")
</pallas_src>

<mosaic_0001>
module attributes {stable_mosaic.version = 11 : i64} {
  func.func @mlp_kernel(%arg0: i32, %arg1: memref<16x360xf32, #tpu.memory_space<vmem>>, %arg2: memref<360x256xbf16, #tpu.memory_space<vmem>>, %arg3: memref<1x256xf32, #tpu.memory_space<vmem>>, %arg4: memref<256x64xbf16, #tpu.memory_space<vmem>>, %arg5: memref<1x64xf32, #tpu.memory_space<vmem>>, %arg6: memref<1x64xf32, #tpu.memory_space<vmem>>, %arg7: memref<1x1xf32, #tpu.memory_space<smem>>, %arg8: memref<16x1xf32, #tpu.memory_space<vmem>>) attributes {dimension_semantics = [#tpu.dimension_semantics<parallel>], iteration_bounds = array<i64: 1>, scalar_prefetch = 0 : i64, scratch_operands = 0 : i64, tpu.core_type = #tpu.core_type<tc>, window_params = [{transform_indices = @transform_0, window_bounds = array<i64: 16, 360>}, {pipeline_mode = #tpu.pipeline_mode<synchronous>, transform_indices = @transform_1, window_bounds = array<i64: 360, 256>}, {pipeline_mode = #tpu.pipeline_mode<synchronous>, transform_indices = @transform_2, window_bounds = array<i64: 1, 256>}, {pipeline_mode = #tpu.pipeline_mode<synchronous>, transform_indices = @transform_3, window_bounds = array<i64: 256, 64>}, {pipeline_mode = #tpu.pipeline_mode<synchronous>, transform_indices = @transform_4, window_bounds = array<i64: 1, 64>}, {pipeline_mode = #tpu.pipeline_mode<synchronous>, transform_indices = @transform_5, window_bounds = array<i64: 1, 64>}, {transform_indices = @transform_6, window_bounds = array<i64: 1, 1>}, {transform_indices = @transform_7, window_bounds = array<i64: 16, 1>}]} {
    %c0 = arith.constant 0 : index
    %c0_0 = arith.constant 0 : index
    %0 = vector.load %arg1[%c0, %c0_0] : memref<16x360xf32, #tpu.memory_space<vmem>>, vector<16x360xf32>
    %1 = arith.truncf %0 : vector<16x360xf32> to vector<16x360xbf16>
    %c0_1 = arith.constant 0 : index
    %c0_2 = arith.constant 0 : index
    %2 = vector.load %arg2[%c0_1, %c0_2] : memref<360x256xbf16, #tpu.memory_space<vmem>>, vector<360x256xbf16>
    %cst = arith.constant dense<0.000000e+00> : vector<16x256xf32>
    %3 = tpu.matmul %1, %2, %cst {dimension_numbers = #tpu.dot_dimension_numbers<[1], [0], [0], [1], [0, 0, 1, 1], [], []>} : vector<16x360xbf16>, vector<360x256xbf16>, vector<16x256xf32> -> vector<16x256xf32>
    %c0_3 = arith.constant 0 : index
    %c0_4 = arith.constant 0 : index
    %4 = vector.load %arg3[%c0_3, %c0_4] : memref<1x256xf32, #tpu.memory_space<vmem>>, vector<1x256xf32>
    %5 = vector.broadcast %4 : vector<1x256xf32> to vector<16x256xf32>
    %6 = arith.addf %3, %5 : vector<16x256xf32>
    %cst_5 = arith.constant 0.000000e+00 : f32
    %7 = vector.broadcast %cst_5 : f32 to vector<16x256xf32>
    %8 = arith.maximumf %6, %7 : vector<16x256xf32>
    %9 = arith.truncf %8 : vector<16x256xf32> to vector<16x256xbf16>
    %c0_6 = arith.constant 0 : index
    %c0_7 = arith.constant 0 : index
    %10 = vector.load %arg4[%c0_6, %c0_7] : memref<256x64xbf16, #tpu.memory_space<vmem>>, vector<256x64xbf16>
    %cst_8 = arith.constant dense<0.000000e+00> : vector<16x64xf32>
    %11 = tpu.matmul %9, %10, %cst_8 {dimension_numbers = #tpu.dot_dimension_numbers<[1], [0], [0], [1], [0, 0, 1, 1], [], []>} : vector<16x256xbf16>, vector<256x64xbf16>, vector<16x64xf32> -> vector<16x64xf32>
    %c0_9 = arith.constant 0 : index
    %c0_10 = arith.constant 0 : index
    %12 = vector.load %arg5[%c0_9, %c0_10] : memref<1x64xf32, #tpu.memory_space<vmem>>, vector<1x64xf32>
    %13 = vector.broadcast %12 : vector<1x64xf32> to vector<16x64xf32>
    %14 = arith.addf %11, %13 : vector<16x64xf32>
    %cst_11 = arith.constant 0.000000e+00 : f32
    %15 = vector.broadcast %cst_11 : f32 to vector<16x64xf32>
    %16 = arith.maximumf %14, %15 : vector<16x64xf32>
    %c0_12 = arith.constant 0 : index
    %c0_13 = arith.constant 0 : index
    %17 = vector.load %arg6[%c0_12, %c0_13] : memref<1x64xf32, #tpu.memory_space<vmem>>, vector<1x64xf32>
    %18 = vector.broadcast %17 : vector<1x64xf32> to vector<16x64xf32>
    %19 = arith.mulf %16, %18 : vector<16x64xf32>
    %cst_14 = arith.constant dense<0.000000e+00> : vector<16xf32>
    %20 = vector.multi_reduction <add>, %19, %cst_14 [1] : vector<16x64xf32> to vector<16xf32>
    %21 = vector.shape_cast %20 : vector<16xf32> to vector<16x1xf32>
    %c0_15 = arith.constant 0 : index
    %c0_16 = arith.constant 0 : index
    %22 = memref.load %arg7[%c0_15, %c0_16] : memref<1x1xf32, #tpu.memory_space<smem>>
    %23 = vector.broadcast %22 : f32 to vector<16x1xf32>
    %24 = arith.addf %21, %23 : vector<16x1xf32>
    %c0_17 = arith.constant 0 : index
    %c0_18 = arith.constant 0 : index
    %25 = vector.load %arg8[%c0_17, %c0_18] : memref<16x1xf32, #tpu.memory_space<vmem>>, vector<16x1xf32>
    tpu.vector_store %arg8[%c0_17, %c0_18], %24 {strides = array<i32>} : memref<16x1xf32, #tpu.memory_space<vmem>>, vector<16x1xf32>,
    return
  }
  func.func @transform_0(%arg0: i32) -> (i32, i32) {
    %c0_i32 = arith.constant 0 : i32
    %c0_i32_0 = arith.constant 0 : i32
    return %arg0, %c0_i32 : i32, i32
  }
  func.func @transform_1(%arg0: i32) -> (i32, i32) {
    %c0_i32 = arith.constant 0 : i32
    %c0_i32_0 = arith.constant 0 : i32
    %c0_i32_1 = arith.constant 0 : i32
    return %c0_i32, %c0_i32_0 : i32, i32
  }
  func.func @transform_2(%arg0: i32) -> (i32, i32) {
    %c0_i32 = arith.constant 0 : i32
    %c0_i32_0 = arith.constant 0 : i32
    %c0_i32_1 = arith.constant 0 : i32
    return %c0_i32, %c0_i32_0 : i32, i32
  }
  func.func @transform_3(%arg0: i32) -> (i32, i32) {
    %c0_i32 = arith.constant 0 : i32
    %c0_i32_0 = arith.constant 0 : i32
    %c0_i32_1 = arith.constant 0 : i32
    return %c0_i32, %c0_i32_0 : i32, i32
  }
  func.func @transform_4(%arg0: i32) -> (i32, i32) {
    %c0_i32 = arith.constant 0 : i32
    %c0_i32_0 = arith.constant 0 : i32
    %c0_i32_1 = arith.constant 0 : i32
    return %c0_i32, %c0_i32_0 : i32, i32
  }
  func.func @transform_5(%arg0: i32) -> (i32, i32) {
    %c0_i32 = arith.constant 0 : i32
    %c0_i32_0 = arith.constant 0 : i32
    %c0_i32_1 = arith.constant 0 : i32
    return %c0_i32, %c0_i32_0 : i32, i32
  }
  func.func @transform_6(%arg0: i32) -> (i32, i32) {
    %c0_i32 = arith.constant 0 : i32
    %c0_i32_0 = arith.constant 0 : i32
    %c0_i32_1 = arith.constant 0 : i32
    return %c0_i32, %c0_i32_0 : i32, i32
  }
  func.func @transform_7(%arg0: i32) -> (i32, i32) {
    %c0_i32 = arith.constant 0 : i32
    %c0_i32_0 = arith.constant 0 : i32
    return %arg0, %c0_i32 : i32, i32
  }
}

</mosaic_0001>

<bundles_post_ra>
// kernel: epigenetic_clock_forward.1
= control target key start
LH: loop header
LB: loop body
LE: loop exit
PB: predicated region body
PF: predicated region fallthrough
CT: control target
= control target key end

     0   :  { %13 = vsyncpa [#allocation4], 0  ;;  %s850_s24 = smov [#allocation3]   ;;  %s992_s0 = inlined_call_operand.vmem [shape: f32[16,360], index: 0, kind: input, shape index: {}]   ;;  %s993_s1 = inlined_call_operand.hbm [shape: bf16[360,256], index: 1, kind: input, shape index: {}]   ;;  %s994_s2 = inlined_call_operand.vmem [shape: f32[1,256], index: 2, kind: input, shape index: {}]   ;;  %s995_s3 = inlined_call_operand.vmem [shape: bf16[256,64], index: 3, kind: input, shape index: {}]   ;;  %s996_s4 = inlined_call_operand.vmem [shape: f32[1,64], index: 4, kind: input, shape index: {}]   ;;  %s997_s5 = inlined_call_operand.vmem [shape: f32[1,64], index: 5, kind: input, shape index: {}]   ;;  %s998_s6 = inlined_call_operand.<no memory space> [shape: f32[1,1], index: 6, kind: input, shape index: {}]   ;;  %s999_s7 = inlined_call_operand.vmem [shape: f32[16,1], index: 7, kind: output, shape index: {}]  }
   0x1   :  { %s21_s25 = sshll.u32 %s850_s24, 4  ;;  %s826_s28 = scalar_lea.hbm %s993_s1, 5760  ;;  %s22_s25 = int_to_ptr.vmem [resolvable:$true] %s21_s25 }
   0x2   :  { %p827_p0 = scmp.ne.s32.totalorder %s993_s1, %s826_s28  ;;  %p830_p1 = scmp.lt.u32.totalorder %s826_s28, %s993_s1 }
   0x4   :  { %p832_p2 = pnand %p830_p1, %p827_p0 }
   0x6   :  { %835 = shalt.err (!%p832_p2)
}
   0x7   :  { %s836_s10 = scalar_lea.vmem %s22_s25, 5760  ;;  %p841_p4 = scmp.lt.s32.totalorder %s22_s25, %s22_s25 }
   0x8   :  { %p837_p3 = scmp.ne.s32.totalorder %s22_s25, %s836_s10  ;;  %p842_p5 = scmp.lt.s32.totalorder %s836_s10, %s836_s10 }
   0xa   :  { %p843_p6 = por %p842_p5, %p841_p4 }
   0xc   :  { %p844_p7 = pnand %p843_p6, %p837_p3 }
   0xe   :  { %847 = shalt.err (!%p844_p7)
}
   0xf   :  { %s851_s11 = smov 128   ;;  %s852_s12 = smov 8  }
  0x10   :  { %27 = dma.hbm_to_vmem [thread:$0]  %s993_s1, 5760, %s22_s25, [#allocation4], %s851_s11, %s851_s11, %s852_s12  }
  0x11   :  { %848 = dma.done.wait [#allocation4], 5760  }
  0x12   :  { %849 = vsyncadd [#allocation4], 4294961536  ;;  %v853_v0 = vmov 0   ;;  %v742_v1 = vld [vmem:[#allocation3 + $0x4] ss:$8 sps:$4 sm:$0xff]   ;;  %vm337_vm0 = vcmask 1043456  }
  0x13   :  { %419 = vmatprep.mubr.bf16.mxu1 %v853_v0  ;;  %v744_v2 = vld [vmem:[#allocation3] ss:$8 sps:$4 sm:$0xff]   ;;  %344 = vmatprep.subr.bf16.mxu0 %v742_v1  ;;  %v745_v3 = vld [vmem:[#allocation3 + $0x14] ss:$8 sps:$4 sm:$0xff]   ;;  %v747_v4 = vld [vmem:[#allocation3 + $0x10] ss:$8 sps:$4 sm:$0xff]  }
  0x14   :  { %345 = vmatpush1.bf16.msra.mxu0 %v744_v2  ;;  %v748_v5 = vld [vmem:[#allocation3 + $0x24] ss:$8 sps:$4 sm:$0xff]   ;;  %v750_v6 = vld [vmem:[#allocation3 + $0x20] ss:$8 sps:$4 sm:$0xff]   ;;  %v751_v7 = vld [vmem:[#allocation3 + $0x34] ss:$8 sps:$4 sm:$0xff]  }
  0x15   :  { %346 = vmatprep.subr.bf16.mxu0 %v745_v3  ;;  %v753_v8 = vld [vmem:[#allocation3 + $0x30] ss:$8 sps:$4 sm:$0xff]   ;;  %v754_v9 = vld [vmem:[#allocation3 + $0x44] ss:$8 sps:$4 sm:$0xff]   ;;  %v756_v11 = vld [vmem:[#allocation3 + $0x40] ss:$8 sps:$4 sm:$0xff]  }
  0x16   :  { %v769_v10 = vld [vmem:[#allocation3 + $0x104] ss:$8 sps:$4 sm:$0xff]   ;;  %v773_v12 = vld [vmem:[#allocation3 + $0x100] ss:$8 sps:$4 sm:$0xff]   ;;  %v775_v13 = vld [vmem:[#allocation3 + $0x114] ss:$8 sps:$4 sm:$0xff]  }
  0x17   :  { %387 = vmatprep.subr.bf16.mxu1 %v769_v10  ;;  %v757_v14 = vld [vmem:[#allocation3 + $0x54] ss:$8 sps:$4 sm:$0xff]   ;;  %v779_v15 = vld [vmem:[#allocation3 + $0x110] ss:$8 sps:$4 sm:$0xff]   ;;  %v781_v16 = vld [vmem:[#allocation3 + $0x124] ss:$8 sps:$4 sm:$0xff]  }
  0x18   :  { %347 = vmatpush1.bf16.msra.mxu0 %v747_v4  ;;  %388 = vmatpush1.bf16.msra.mxu1 %v773_v12  ;;  %v759_v17 = vld [vmem:[#allocation3 + $0x50] ss:$8 sps:$4 sm:$0xff]   ;;  %v760_v18 = vld [vmem:[#allocation3 + $0x64] ss:$8 sps:$4 sm:$0xff]   ;;  %v785_v19 = vld [vmem:[#allocation3 + $0x120] ss:$8 sps:$4 sm:$0xff]  }
  0x19   :  { %348 = vmatprep.subr.bf16.mxu0 %v748_v5  ;;  %389 = vmatprep.subr.bf16.mxu1 %v775_v13  ;;  %v787_v20 = vld [vmem:[#allocation3 + $0x134] ss:$8 sps:$4 sm:$0xff]   ;;  %v762_v21 = vld [vmem:[#allocation3 + $0x60] ss:$8 sps:$4 sm:$0xff]   ;;  %v791_v23 = vld [vmem:[#allocation3 + $0x130] ss:$8 sps:$4 sm:$0xff]  }
  0x1a   :  { %v763_v22 = vld [vmem:[#allocation3 + $0x74] ss:$8 sps:$4 sm:$0xff]   ;;  %v793_v24 = vld [vmem:[#allocation3 + $0x144] ss:$8 sps:$4 sm:$0xff]   ;;  %v765_v25 = vld [vmem:[#allocation3 + $0x70] ss:$8 sps:$4 sm:$0xff]  }
  0x1b   :  { %v766_v26 = vld [vmem:[#allocation3 + $0x84] ss:$8 sps:$4 sm:$0xff]   ;;  %v797_v27 = vld [vmem:[#allocation3 + $0x140] ss:$8 sps:$4 sm:$0xff]   ;;  %v799_v28 = vld [vmem:[#allocation3 + $0x154] ss:$8 sps:$4 sm:$0xff]  }
  0x1c   :  { %349 = vmatpush1.bf16.msra.mxu0 %v750_v6  ;;  %390 = vmatpush1.bf16.msra.mxu1 %v779_v15  ;;  %v43_v29 = vld [vmem:[%s992_s0 + $0x8] sm:$0xff]  ;;  %v95_v30 = vld [vmem:[#allocation3 + $0x160] sm:$0xff]  ;;  %v771_v33 = vld [vmem:[#allocation3 + $0x94] ss:$8 sps:$4 sm:$0xff]   ;;  %vm333_vm1 = vcmask 850944   ;;  %vm623_vm2 = vcmask 523264  }
  0x1d   :  { %350 = vmatprep.subr.bf16.mxu0 %v751_v7  ;;  %391 = vmatprep.subr.bf16.mxu1 %v781_v16  ;;  %v46_v31 = vld [vmem:[%s992_s0 + $0x20] sm:$0xff]  ;;  %v803_v35 = vld [vmem:[#allocation3 + $0x150] ss:$8 sps:$4 sm:$0xff]   ;;  %v687_v37 = vcombine.high %v95_v30, %v95_v30  ;;  %v686_v38 = vcombine.low %v95_v30, %v95_v30  ;;  %v47_v41 = vld [vmem:[%s992_s0 + $0x28] sm:$0xff]  ;;  %vm634_vm3 = vcmask 7168  }
  0x1e   :  { %v768_v32 = vld [vmem:[#allocation3 + $0x80] ss:$8 sps:$4 sm:$0xff]   ;;  %v49_v34 = vpack.c.bf16 %v46_v31, %v43_v29  ;;  %v774_v36 = vld [vmem:[#allocation3 + $0x90] ss:$8 sps:$4 sm:$0xff]   ;;  %v777_v39 = vld [vmem:[#allocation3 + $0xa4] ss:$8 sps:$4 sm:$0xff]  }
  0x1f   :  { %v44_v40 = vld [vmem:[%s992_s0 + $0x10] sm:$0xff]  ;;  %v339_v42 = vsel %vm337_vm0, %v686_v38, 0  ;;  %v810_v43 = vld [vmem:[%s995_s3 + $0x40] sm:$0xff]   ;;  %v812_v49 = vld [vmem:[%s995_s3 + $0x48] sm:$0xff]  }
  0x20   :  { %351 = vmatpush1.bf16.msra.mxu0 %v753_v8  ;;  %392 = vmatpush1.bf16.msra.mxu1 %v785_v19  ;;  %v780_v44 = vld [vmem:[#allocation3 + $0xa0] ss:$8 sps:$4 sm:$0xff]   ;;  %v783_v45 = vld [vmem:[#allocation3 + $0xb4] ss:$8 sps:$4 sm:$0xff]   ;;  %v50_v46 = vpack.c.bf16 %v47_v41, %v44_v40  ;;  %v786_v48 = vld [vmem:[#allocation3 + $0xb0] ss:$8 sps:$4 sm:$0xff]  }
  0x21   :  { %352 = vmatprep.subr.bf16.mxu0 %v754_v9  ;;  %393 = vmatprep.subr.bf16.mxu1 %v787_v20  ;;  %v811_v47 = vld [vmem:[%s995_s3] sm:$0xff]   ;;  %v813_v51 = vld [vmem:[%s995_s3 + $0x8] sm:$0xff]   ;;  %v814_v52 = vld [vmem:[%s995_s3 + $0x50] sm:$0xff]  }
  0x22   :  { %376 = vmatprep.mubr.bf16.mxu0 %v49_v34  ;;  %v789_v50 = vld [vmem:[#allocation3 + $0xc4] ss:$8 sps:$4 sm:$0xff]   ;;  %v792_v53 = vld [vmem:[#allocation3 + $0xc0] ss:$8 sps:$4 sm:$0xff]   ;;  %v795_v54 = vld [vmem:[#allocation3 + $0xd4] ss:$8 sps:$4 sm:$0xff]  }
  0x23   :  { %v815_v55 = vld [vmem:[%s995_s3 + $0x10] sm:$0xff]   ;;  %v816_v56 = vld [vmem:[%s995_s3 + $0x58] sm:$0xff]   ;;  %v801_v58 = vld [vmem:[#allocation3 + $0xe4] ss:$8 sps:$4 sm:$0xff]  }
  0x24   :  { %353 = vmatpush1.bf16.msra.mxu0 %v756_v11  ;;  %394 = vmatpush1.bf16.msra.mxu1 %v791_v23  ;;  %v798_v57 = vld [vmem:[#allocation3 + $0xd0] ss:$8 sps:$4 sm:$0xff]   ;;  %v818_v60 = vld [vmem:[%s995_s3 + $0x60] sm:$0xff]   ;;  %v806_v62 = vld [vmem:[#allocation3 + $0xf4] ss:$8 sps:$4 sm:$0xff]  }
  0x25   :  { %354 = vmatprep.subr.bf16.mxu0 %v757_v14  ;;  %395 = vmatprep.subr.bf16.mxu1 %v793_v24  ;;  %v817_v59 = vld [vmem:[%s995_s3 + $0x18] sm:$0xff]   ;;  %v804_v61 = vld [vmem:[#allocation3 + $0xe0] ss:$8 sps:$4 sm:$0xff]   ;;  %v822_v6 = vld [vmem:[%s995_s3 + $0x70] sm:$0xff]   ;;  %v98_v14 = vlaneseq }
  0x26   :  { %v819_v63 = vld [vmem:[%s995_s3 + $0x20] sm:$0xff]   ;;  %v809_v0 = vld [vmem:[#allocation3 + $0xf0] ss:$8 sps:$4 sm:$0xff]   ;;  %v820_v4 = vld [vmem:[%s995_s3 + $0x68] sm:$0xff]  }
  0x27   :  { %v42_v1 = vld [vmem:[%s992_s0] sm:$0xff]  ;;  %v45_v2 = vld [vmem:[%s992_s0 + $0x18] sm:$0xff]  ;;  %v821_v5 = vld [vmem:[%s995_s3 + $0x28] sm:$0xff]   ;;  %v99_v15 = vshrl.u32 %v98_v14, 7 }
  0x28   :  { %355 = vmatpush1.bf16.msra.mxu0 %v759_v17  ;;  %396 = vmatpush1.bf16.msra.mxu1 %v797_v27  ;;  %v48_v3 = vpack.c.bf16 %v45_v2, %v42_v1  ;;  %v823_v7 = vld [vmem:[%s995_s3 + $0x30] sm:$0xff]   ;;  %v824_v8 = vld [vmem:[%s995_s3 + $0x78] sm:$0xff]   ;;  %v96_v17 = vld [vmem:[%s994_s2] sm:$0x3] }
  0x29   :  { %356 = vmatprep.subr.bf16.mxu0 %v760_v18  ;;  %397 = vmatprep.subr.bf16.mxu1 %v799_v28  ;;  %v825_v9 = vld [vmem:[%s995_s3 + $0x38] sm:$0xff]   ;;  %v100_v16 = vsub.s32 0, %v99_v15  ;;  %v104_v18 = vsub.s32 1, %v99_v15  ;;  %v690_v40 = vld [vmem:[%s996_s4] ss:$0 sm:$0xff] }
  0x2b   :  { %v101_v19 = vrot.slane %v96_v17, %v100_v16  ;;  %v105_v20 = vrot.slane %v96_v17, %v104_v18 }
  0x2c   :  { %357 = vmatpush1.bf16.msra.mxu0 %v762_v21  ;;  %398 = vmatpush1.bf16.msra.mxu1 %v803_v35 }
  0x2d   :  { %358 = vmatprep.subr.bf16.mxu0 %v763_v22  ;;  %688 = vmatprep.subr.msk.bf16.mxu1 %vm337_vm0, %v687_v37 }
  0x30   :  { %359 = vmatpush1.bf16.msra.mxu0 %v765_v25  ;;  %400 = vmatpush1.bf16.msra.mxu1 %v339_v42 }
  0x31   :  { %360 = vmatprep.subr.bf16.mxu0 %v766_v26  ;;  %708 = vmatprep.subr.bf16.mxu1 %v810_v43 }
  0x33   :  { %689 = vmatmul.mubr.msk.bf16.vlgmr.msra.gmra.mrb[0].mxu1 %vm333_vm1, %v50_v46 }
  0x34   :  { %361 = vmatpush1.bf16.msra.mxu0 %v768_v32  ;;  %709 = vmatpush3.bf16.msra.mxu1 %v811_v47  ;;  %v707_v47 = vld [vmem:[%s997_s5] ss:$0 sm:$0xff] }
  0x35   :  { %362 = vmatprep.subr.bf16.mxu0 %v771_v33  ;;  %710 = vmatprep.subr.bf16.mxu1 %v812_v49 }
  0x38   :  { %363 = vmatpush1.bf16.msra.mxu0 %v774_v36  ;;  %711 = vmatpush3.bf16.msra.mxu1 %v813_v51 }
  0x39   :  { %364 = vmatprep.subr.bf16.mxu0 %v777_v39  ;;  %712 = vmatprep.subr.bf16.mxu1 %v814_v52 }
  0x3c   :  { %365 = vmatpush1.bf16.msra.mxu0 %v780_v44  ;;  %713 = vmatpush3.bf16.msra.mxu1 %v815_v55  ;;  %v631_v55 = vstv %s998_s6 }
  0x3d   :  { %366 = vmatprep.subr.bf16.mxu0 %v783_v45  ;;  %714 = vmatprep.subr.bf16.mxu1 %v816_v56 }
  0x40   :  { %367 = vmatpush1.bf16.msra.mxu0 %v786_v48  ;;  %715 = vmatpush3.bf16.msra.mxu1 %v817_v59 }
  0x41   :  { %368 = vmatprep.subr.bf16.mxu0 %v789_v50  ;;  %716 = vmatprep.subr.bf16.mxu1 %v818_v60 }
  0x44   :  { %369 = vmatpush1.bf16.msra.mxu0 %v792_v53  ;;  %717 = vmatpush3.bf16.msra.mxu1 %v819_v63 }
  0x45   :  { %370 = vmatprep.subr.bf16.mxu0 %v795_v54  ;;  %718 = vmatprep.subr.bf16.mxu1 %v820_v4 }
  0x48   :  { %371 = vmatpush1.bf16.msra.mxu0 %v798_v57  ;;  %719 = vmatpush3.bf16.msra.mxu1 %v821_v5 }
  0x49   :  { %372 = vmatprep.subr.bf16.mxu0 %v801_v58  ;;  %720 = vmatprep.subr.bf16.mxu1 %v822_v6 }
  0x4c   :  { %373 = vmatpush1.bf16.msra.mxu0 %v804_v61  ;;  %721 = vmatpush3.bf16.msra.mxu1 %v823_v7 }
  0x4d   :  { %374 = vmatprep.subr.bf16.mxu0 %v806_v62  ;;  %722 = vmatprep.subr.bf16.mxu1 %v824_v8 }
  0x50   :  { %375 = vmatpush1.bf16.msra.mxu0 %v809_v0  ;;  %723 = vmatpush3.bf16.msra.mxu1 %v825_v9 }
  0x53   :  { %377 = vmatmul.mubr.bf16.vlgmr.msra.gmra.mrb[0].mxu0 %v48_v3 }
 0x106   :  { %v421_v10 = vpop.f32.mrb[0].mxu1 }
 0x107   :  { %v423_v11 = vpop.f32.mrb[1].mxu1 }
 0x108   :  { %v425_v12 = vpop.f32.mrb[2].mxu1 }
 0x109   :  { %v427_v13 = vpop.f32.mrb[3].mxu1 }
 0x126   :  { %v378_v21 = vpop.f32.mrb[0].mxu0 }
 0x127   :  { %v379_v22 = vadd.f32 %v378_v21, %v101_v19  ;;  %v380_v23 = vpop.f32.mrb[1].mxu0 }
 0x128   :  { %v381_v24 = vadd.f32 %v380_v23, %v105_v20  ;;  %v382_v25 = vpop.f32.mrb[2].mxu0 }
 0x129   :  { %v422_v26 = vadd.f32 %v421_v10, %v379_v22  ;;  %v383_v27 = vadd.f32 %v382_v25, %v101_v19  ;;  %v384_v28 = vpop.f32.mrb[3].mxu0 }
 0x12a   :  { %v424_v29 = vadd.f32 %v423_v11, %v381_v24  ;;  %v385_v30 = vadd.f32 %v384_v28, %v105_v20 }
 0x12b   :  { %v426_v31 = vadd.f32 %v425_v12, %v383_v27  ;;  %v430_v33 = vmax.f32 %v422_v26, 0.0 }
 0x12c   :  { %v428_v32 = vadd.f32 %v427_v13, %v385_v30  ;;  %v431_v35 = vmax.f32 %v424_v29, 0.0 }
 0x12d   :  { %v432_v34 = vmax.f32 %v426_v31, 0.0 }
 0x12e   :  { %v433_v36 = vmax.f32 %v428_v32, 0.0 }
 0x12f   :  { %v434_v37 = vpack.c.bf16 %v432_v34, %v430_v33 }
 0x130   :  { %v435_v38 = vpack.c.bf16 %v433_v36, %v431_v35 }
 0x132   :  { %603 = vmatprep.mubr.bf16.mxu1 %v435_v38 }
 0x133   :  { %604 = vmatmul.mubr.bf16.vlgmr.msra.gmra.mrb[4].mxu1 %v434_v37 }
 0x206   :  { %v724_v39 = vpop.f32.mrb[4].mxu1 }
 0x207   :  { %v725_v41 = vpop.f32.mrb[5].mxu1 }
 0x208   :  { %v726_v42 = vadd.f32 %v725_v41, %v724_v39  ;;  %v727_v43 = vpop.f32.mrb[6].mxu1 }
 0x209   :  { %v728_v44 = vpop.f32.mrb[7].mxu1 }
 0x20a   :  { %v606_v45 = vadd.f32 %v726_v42, %v690_v40  ;;  %v729_v46 = vadd.f32 %v728_v44, %v727_v43 }
 0x20c   :  { %v612_v48 = vmax.f32 %v606_v45, 0.0  ;;  %v609_v49 = vadd.f32 %v729_v46, %v690_v40 }
 0x20e   :  { %v613_v50 = vmax.f32 %v609_v49, 0.0  ;;  %v621_v51 = vmul.f32 %v707_v47, %v612_v48 }
 0x210   :  { %v624_v52 = vsel %vm623_vm2, %v621_v51, 0.0  ;;  %v622_v53 = vmul.f32 %v707_v47, %v613_v50 }
 0x211   :  { %625 = vadd.xlane.f32.xlu0 %v624_v52 }
 0x212   :  { %v627_v54 = vsel %vm623_vm2, %v622_v53, 0.0 }
 0x215   :  { %628 = vadd.xlane.f32.xlu0 %v627_v54 }
 0x29e   :  { %v626_v56 = vpop.xlane.xlu0 %625 }
 0x29f   :  { %v632_v57 = vadd.f32 %v631_v55, %v626_v56 }
 0x2a1   :  { %635 = vst.msk [vmem:[%s999_s7] sm:$0xff] %vm634_vm3, %v632_v57 }
 0x2a2   :  { %v629_v58 = vpop.xlane.xlu0 %628 }
 0x2a3   :  { %v633_v59 = vadd.f32 %v631_v55, %v629_v58 }
 0x2a5   :  { %636 = vst.msk [vmem:[%s999_s7 + $0x8] sm:$0xff] %vm634_vm3, %v633_v59 }
 0x2a6   :  { %641 = vsyncpa [#allocation4], 1 }

</bundles_post_ra>
